<compile_context>
chip_gen: v7x
topology: tpu7x:2x2x1
jax: 0.10.0
libtpu: 0.0.40
codegen_flags: <defaults>
</compile_context>

<pallas_src>
import functools
import math

import jax
import jax.numpy as jnp
from jax.experimental import pallas as pl
from jax.experimental.pallas import tpu as pltpu


def _round_up(x, m):
    return (x + m - 1) // m * m


def _vmem_capacity_bytes(default=64 * 1024 * 1024):
    """Physical VMEM per core; falls back to the v7x (smallest) value."""
    try:
        info = pltpu.get_tpu_info()
        cap = getattr(info, "vmem_capacity_bytes", None)
        if cap:
            return int(cap)
    except Exception:
        pass
    return default


def _dsmil_attention_kernel(qmax_ref, q_ref, o_ref, m_ref, l_ref, *,
                            inv_sqrt_d, n_valid, n_tile):
    """One independent N-tile: unnormalized exp + local softmax stats."""
    t = pl.program_id(0)

    # (C, n_tile) scores, lane-dense over the instance axis.  Both operands are
    # contracted on their minor dim (flash-attention q@k^T pattern) so the big
    # streamed q tile feeds the MXU without a wrapper-side transpose.  Native
    # dtype in, f32 accumulation out.
    s = jax.lax.dot_general(
        qmax_ref[...], q_ref[...],
        dimension_numbers=(((1,), (1,)), ((), ())),
        preferred_element_type=jnp.float32,
    ) * inv_sqrt_d

    needs_mask = (n_valid % n_tile) != 0   # static: only the last tile is ragged
    if needs_mask:
        col = t * n_tile + jax.lax.broadcasted_iota(jnp.int32, s.shape, 1)
        valid = col < n_valid
        s = jnp.where(valid, s, -jnp.inf)   # kills boundary-block garbage too

    # Local (per-tile) per-class statistics; no cross-tile dependency.
    m_t = jnp.max(s, axis=1, keepdims=True)          # (C, 1)
    p = jnp.exp(s - m_t)                              # (C, n_tile)
    if needs_mask:
        p = jnp.where(valid, p, 0.0)                  # NaN-proof even if fully masked
    l_t = jnp.sum(p, axis=1, keepdims=True)           # (C, 1)

    o_ref[...] = p                                     # unnormalized exp(s - m_t)
    # Stats blocks are 128 lanes wide purely to satisfy the (8,128) tiling rule;
    # the wrapper reads lane 0 of each block.
    m_ref[...] = jnp.broadcast_to(m_t, m_ref.shape)
    l_ref[...] = jnp.broadcast_to(l_t, l_ref.shape)


def dsmil_attention(q, q_max, *, n_tile=None):
    """softmax((q @ q_max.T) / sqrt(D), axis=0) -> float32 (N, C)."""
    N, D = q.shape
    C, D2 = q_max.shape
    assert D == D2, "feature dims must match"
    inv_sqrt_d = 1.0 / math.sqrt(float(D))

    itemsize = jnp.dtype(q.dtype).itemsize
    vmem_cap = _vmem_capacity_bytes()

    if n_tile is None:
        # ~vmem/10 per q tile: ~6.4 MiB on v7x (64 MiB), ~12.8 MiB on v5e/v6e.
        q_tile_budget = max(2 * 1024 * 1024, vmem_cap // 10)
        n_tile = q_tile_budget // max(D * itemsize, 1)
    n_tile = max(128, (int(n_tile) // 128) * 128)   # lane-width multiples only
    n_tile = min(n_tile, 32768)                     # review cap
    n_tile = min(n_tile, _round_up(N, 128))         # don't exceed the problem

    nt = -(-N // n_tile)          # number of N tiles (last may be a boundary block)
    n_pad = nt * n_tile           # padded column count of the kernel output only

    # VMEM budget derived from the actual buffer set (q & out double-buffered,
    # f32 score temporaries, resident q_max, stats), clamped per generation.
    q_tile_bytes = n_tile * D * itemsize
    out_tile_bytes = C * n_tile * 4
    working = (2 * q_tile_bytes + 2 * out_tile_bytes + 4 * out_tile_bytes
               + 2 * C * D * 4 + 4 * (C * 128 * 4))
    vmem_limit = int(min(max(working + (4 << 20), 16 << 20), (vmem_cap * 9) // 10))

    kernel = functools.partial(
        _dsmil_attention_kernel,
        inv_sqrt_d=inv_sqrt_d, n_valid=N, n_tile=n_tile)

    raw, m_s, l_s = pl.pallas_call(
        kernel,
        out_shape=(
            jax.ShapeDtypeStruct((C, n_pad), jnp.float32),      # exp(s - m_t)
            jax.ShapeDtypeStruct((C, nt * 128), jnp.float32),   # per-tile max
            jax.ShapeDtypeStruct((C, nt * 128), jnp.float32),   # per-tile sumexp
        ),
        grid=(nt,),
        in_specs=[
            # q_max is tiny and stays resident (constant block index).
            pl.BlockSpec((C, D), lambda t: (0, 0)),
            # q streamed tile-by-tile; double-buffered by the BlockSpec pipeline.
            pl.BlockSpec((n_tile, D), lambda t: (t, 0)),
        ],
        out_specs=(
            pl.BlockSpec((C, n_tile), lambda t: (0, t)),
            pl.BlockSpec((C, 128), lambda t: (0, t)),
            pl.BlockSpec((C, 128), lambda t: (0, t)),
        ),
        compiler_params=pltpu.CompilerParams(
            dimension_semantics=("parallel",),   # tiles independent -> megacore OK
            vmem_limit_bytes=vmem_limit,
        ),
    )(q_max, q)

    # Global combine over the tiny (C, nt) stats + per-tile correction.
    m_t = m_s[:, ::128]                                     # (C, nt)
    l_t = l_s[:, ::128]                                     # (C, nt)
    m_g = jnp.max(m_t, axis=1, keepdims=True)               # (C, 1)
    alpha = jnp.where(jnp.isfinite(m_t), jnp.exp(m_t - m_g), 0.0)   # (C, nt)
    l_g = jnp.sum(l_t * alpha, axis=1, keepdims=True)       # (C, 1)
    factor = alpha / l_g                                     # exact division

    out = raw.reshape(C, nt, n_tile) * factor[:, :, None]
    return out.reshape(C, n_pad)[:, :N].T                    # (N, C) float32


def _reference(q, q_max):
    d = q.shape[1]
    attn = (q.astype(jnp.float32) @ q_max.astype(jnp.float32).T) / jnp.sqrt(
        jnp.float32(d))
    return jax.nn.softmax(attn, axis=0)


if __name__ == "__main__":
    key = jax.random.PRNGKey(0)
    k1, k2, k3, k4 = jax.random.split(key, 4)

    # --- Test 1: small f32 bag (matches the PyTorch module defaults) ---------
    N, D, C = 8, 32, 2
    q = jax.random.normal(k1, (N, D), dtype=jnp.float32)
    q_max = jax.random.normal(k2, (C, D), dtype=jnp.float32)

    out = dsmil_attention(q, q_max)
    jax.block_until_ready(out)
    ref = _reference(q, q_max)
    assert out.shape == (N, C)
    assert jnp.allclose(out, ref, atol=2e-3, rtol=2e-3), "mismatch vs reference (f32)"

    # --- Test 2: multi-tile + ragged last tile, bf16 into the MXU, under jit --
    N2, D2, C2 = 300, 64, 3
    q2 = jax.random.normal(k3, (N2, D2), dtype=jnp.bfloat16)
    q_max2 = jax.random.normal(k4, (C2, D2), dtype=jnp.bfloat16)

    jitted = jax.jit(functools.partial(dsmil_attention, n_tile=128))  # 3 N tiles
    out2 = jitted(q2, q_max2)
    jax.block_until_ready(out2)
    ref2 = _reference(q2, q_max2)
    assert out2.shape == (N2, C2)
    assert jnp.allclose(out2, ref2, atol=2e-3, rtol=2e-3), "mismatch vs reference (bf16)"

    print("KERNEL_OK")
</pallas_src>

<mosaic_0001>
module attributes {stable_mosaic.version = 11 : i64} {
  func.func @_dsmil_attention_kernel(%arg0: i32, %arg1: memref<2x32xf32, #tpu.memory_space<vmem>>, %arg2: memref<128x32xf32, #tpu.memory_space<vmem>>, %arg3: memref<2x128xf32, #tpu.memory_space<vmem>>, %arg4: memref<2x128xf32, #tpu.memory_space<vmem>>, %arg5: memref<2x128xf32, #tpu.memory_space<vmem>>) attributes {dimension_semantics = [#tpu.dimension_semantics<parallel>], iteration_bounds = array<i64: 1>, scalar_prefetch = 0 : i64, scratch_operands = 0 : i64, tpu.core_type = #tpu.core_type<tc>, window_params = [{pipeline_mode = #tpu.pipeline_mode<synchronous>, transform_indices = @transform_0, window_bounds = array<i64: 2, 32>}, {transform_indices = @transform_1, window_bounds = array<i64: 128, 32>}, {transform_indices = @transform_2, window_bounds = array<i64: 2, 128>}, {transform_indices = @transform_3, window_bounds = array<i64: 2, 128>}, {transform_indices = @transform_4, window_bounds = array<i64: 2, 128>}]} {
    %c0 = arith.constant 0 : index
    %c0_0 = arith.constant 0 : index
    %0 = vector.load %arg1[%c0, %c0_0] : memref<2x32xf32, #tpu.memory_space<vmem>>, vector<2x32xf32>
    %c0_1 = arith.constant 0 : index
    %c0_2 = arith.constant 0 : index
    %1 = vector.load %arg2[%c0_1, %c0_2] : memref<128x32xf32, #tpu.memory_space<vmem>>, vector<128x32xf32>
    %cst = arith.constant dense<0.000000e+00> : vector<2x128xf32>
    %2 = tpu.matmul %0, %1, %cst {dimension_numbers = #tpu.dot_dimension_numbers<[1], [1], [0], [0], [0, 0, 1, 0], [], []>} : vector<2x32xf32>, vector<128x32xf32>, vector<2x128xf32> -> vector<2x128xf32>
    %cst_3 = arith.constant 0.176776692 : f32
    %3 = vector.broadcast %cst_3 : f32 to vector<2x128xf32>
    %4 = arith.mulf %2, %3 : vector<2x128xf32>
    %c128_i32 = arith.constant 128 : i32
    %5 = arith.muli %arg0, %c128_i32 : i32
    %6 = tpu.iota {dimensions = array<i32: 1>} : vector<2x128xi32>
    %7 = vector.broadcast %5 : i32 to vector<2x128xi32>
    %8 = arith.addi %7, %6 : vector<2x128xi32>
    %c8_i32 = arith.constant 8 : i32
    %9 = vector.broadcast %c8_i32 : i32 to vector<2x128xi32>
    %10 = arith.cmpi slt, %8, %9 : vector<2x128xi32>
    %cst_4 = arith.constant 0xFF800000 : f32
    %11 = vector.broadcast %cst_4 : f32 to vector<2x128xf32>
    %12 = arith.select %10, %4, %11 : vector<2x128xi1>, vector<2x128xf32>
    %cst_5 = arith.constant dense<0xFF800000> : vector<2xf32>
    %13 = vector.multi_reduction <maximumf>, %12, %cst_5 [1] : vector<2x128xf32> to vector<2xf32>
    %14 = vector.shape_cast %13 : vector<2xf32> to vector<2x1xf32>
    %15 = vector.broadcast %14 : vector<2x1xf32> to vector<2x128xf32>
    %16 = arith.subf %12, %15 : vector<2x128xf32>
    %17 = math.exp %16 : vector<2x128xf32>
    %cst_6 = arith.constant 0.000000e+00 : f32
    %18 = vector.broadcast %cst_6 : f32 to vector<2x128xf32>
    %19 = arith.select %10, %17, %18 : vector<2x128xi1>, vector<2x128xf32>
    %cst_7 = arith.constant dense<0.000000e+00> : vector<2xf32>
    %20 = vector.multi_reduction <add>, %19, %cst_7 [1] : vector<2x128xf32> to vector<2xf32>
    %21 = vector.shape_cast %20 : vector<2xf32> to vector<2x1xf32>
    %c0_8 = arith.constant 0 : index
    %c0_9 = arith.constant 0 : index
    %22 = vector.load %arg3[%c0_8, %c0_9] : memref<2x128xf32, #tpu.memory_space<vmem>>, vector<2x128xf32>
    tpu.vector_store %arg3[%c0_8, %c0_9], %19 {strides = array<i32>} : memref<2x128xf32, #tpu.memory_space<vmem>>, vector<2x128xf32>,
    %23 = vector.shape_cast %14 : vector<2x1xf32> to vector<2x1xf32>
    %24 = vector.broadcast %23 : vector<2x1xf32> to vector<2x128xf32>
    %c0_10 = arith.constant 0 : index
    %c0_11 = arith.constant 0 : index
    %25 = vector.load %arg4[%c0_10, %c0_11] : memref<2x128xf32, #tpu.memory_space<vmem>>, vector<2x128xf32>
    tpu.vector_store %arg4[%c0_10, %c0_11], %24 {strides = array<i32>} : memref<2x128xf32, #tpu.memory_space<vmem>>, vector<2x128xf32>,
    %26 = vector.shape_cast %21 : vector<2x1xf32> to vector<2x1xf32>
    %27 = vector.broadcast %26 : vector<2x1xf32> to vector<2x128xf32>
    %c0_12 = arith.constant 0 : index
    %c0_13 = arith.constant 0 : index
    %28 = vector.load %arg5[%c0_12, %c0_13] : memref<2x128xf32, #tpu.memory_space<vmem>>, vector<2x128xf32>
    tpu.vector_store %arg5[%c0_12, %c0_13], %27 {strides = array<i32>} : memref<2x128xf32, #tpu.memory_space<vmem>>, vector<2x128xf32>,
    return
  }
  func.func @transform_0(%arg0: i32) -> (i32, i32) {
    %c0_i32 = arith.constant 0 : i32
    %c0_i32_0 = arith.constant 0 : i32
    %c0_i32_1 = arith.constant 0 : i32
    return %c0_i32, %c0_i32_0 : i32, i32
  }
  func.func @transform_1(%arg0: i32) -> (i32, i32) {
    %c0_i32 = arith.constant 0 : i32
    %c0_i32_0 = arith.constant 0 : i32
    return %arg0, %c0_i32 : i32, i32
  }
  func.func @transform_2(%arg0: i32) -> (i32, i32) {
    %c0_i32 = arith.constant 0 : i32
    %c0_i32_0 = arith.constant 0 : i32
    return %c0_i32, %arg0 : i32, i32
  }
  func.func @transform_3(%arg0: i32) -> (i32, i32) {
    %c0_i32 = arith.constant 0 : i32
    %c0_i32_0 = arith.constant 0 : i32
    return %c0_i32, %arg0 : i32, i32
  }
  func.func @transform_4(%arg0: i32) -> (i32, i32) {
    %c0_i32 = arith.constant 0 : i32
    %c0_i32_0 = arith.constant 0 : i32
    return %c0_i32, %arg0 : i32, i32
  }
}

</mosaic_0001>

<bundles_post_ra>
// kernel: tpu_custom_call.1
= control target key start
LH: loop header
LB: loop body
LE: loop exit
PB: predicated region body
PF: predicated region fallthrough
CT: control target
= control target key end

     0   :  { %10 = vsyncpa [#allocation3], 0  ;;  %s595_s0 = inlined_call_operand.hbm [shape: f32[2,32], index: 0, kind: input, shape index: {}]   ;;  %s596_s1 = inlined_call_operand.hbm [shape: f32[8,32], index: 1, kind: input, shape index: {}]   ;;  %s597_s2 = inlined_call_operand.hbm [shape: f32[2,128], index: 2, kind: output, shape index: {0}]   ;;  %s598_s3 = inlined_call_operand.hbm [shape: f32[2,128], index: 3, kind: output, shape index: {1}]   ;;  %s599_s4 = inlined_call_operand.hbm [shape: f32[2,128], index: 4, kind: output, shape index: {2}]  }
   0x1   :  { %11 = vsyncpa [#allocation6], 0 }
   0x2   :  { %12 = vsyncpa [#allocation4], 0 }
   0x3   :  { %13 = vsyncpa [#allocation9], 0  ;;  %s477_s15 = smov [#allocation2]   ;;  %s359_s19 = scalar_lea.hbm %s595_s0, 32 }
   0x4   :  { %s20_s16 = sshll.u32 %s477_s15, 4  ;;  %p360_p0 = scmp.ne.s32.totalorder %s595_s0, %s359_s19  ;;  %s21_s16 = int_to_ptr.vmem [resolvable:$true] %s20_s16 }
   0x5   :  { %p363_p1 = scmp.lt.u32.totalorder %s359_s19, %s595_s0 }
   0x7   :  { %p365_p2 = pnand %p363_p1, %p360_p0 }
   0x9   :  { %368 = shalt.err (!%p365_p2)
}
   0xa   :  { %s369_s24 = scalar_lea.vmem %s21_s16, 32  ;;  %p374_p4 = scmp.lt.s32.totalorder %s21_s16, %s21_s16 }
   0xb   :  { %p370_p3 = scmp.ne.s32.totalorder %s21_s16, %s369_s24  ;;  %p375_p5 = scmp.lt.s32.totalorder %s369_s24, %s369_s24 }
   0xd   :  { %p376_p6 = por %p375_p5, %p374_p4 }
   0xf   :  { %p377_p7 = pnand %p376_p6, %p370_p3 }
  0x11   :  { %380 = shalt.err (!%p377_p7)
}
  0x12   :  { %23 = dma.hbm_to_vmem [thread:$0]  %s595_s0, 32, %s21_s16, [#allocation3]  }
  0x13   :  { %28 = vsyncadd [#allocation6], 1920  ;;  %s478_s27 = smov [#allocation5]   ;;  %s381_s5 = scalar_lea.hbm %s596_s1, 128 }
  0x14   :  { %s29_s28 = sshll.u32 %s478_s27, 4  ;;  %p382_p8 = scmp.ne.s32.totalorder %s596_s1, %s381_s5  ;;  %s30_s28 = int_to_ptr.vmem [resolvable:$true] %s29_s28 }
  0x15   :  { %p385_p9 = scmp.lt.u32.totalorder %s381_s5, %s596_s1 }
  0x17   :  { %p387_p10 = pnand %p385_p9, %p382_p8 }
  0x19   :  { %390 = shalt.err (!%p387_p10)
}
  0x1a   :  { %s391_s10 = scalar_lea.vmem %s30_s28, 128  ;;  %s395_s0 = scalar_lea.vmem %s30_s28, 2048 }
  0x1b   :  { %p392_p11 = scmp.ne.s32.totalorder %s30_s28, %s391_s10  ;;  %p396_p12 = scmp.lt.s32.totalorder %s30_s28, %s30_s28 }
  0x1c   :  { %p397_p13 = scmp.lt.s32.totalorder %s395_s0, %s391_s10 }
  0x1e   :  { %p398_p0 = por %p397_p13, %p396_p12 }
  0x20   :  { %p399_p1 = pnand %p398_p0, %p392_p11 }
  0x22   :  { %402 = shalt.err (!%p399_p1)
}
  0x23   :  { %s479_s11 = smov 128   ;;  %s480_s12 = smov 8  }
  0x24   :  { %35 = dma.hbm_to_vmem [thread:$0]  %s596_s1, 128, %s30_s28, [#allocation6], %s479_s11, %s479_s11, %s480_s12  }
  0x25   :  { %469 = dma.done.wait [#allocation3], 32  }
  0x26   :  { %470 = vsyncadd [#allocation3], 4294967264 }
  0x27   :  { %471 = dma.done.wait [#allocation6], 2048  }
  0x28   :  { %472 = vsyncadd [#allocation6], 4294965248  ;;  %v481_v0 = vmov 0.0|0.0   ;;  %vm482_vm0 = vmmov 0   ;;  %v483_v1 = vmov 0.0   ;;  %vm59_vm1 = vcmask 261120  }
  0x29   :  { %315 = vmatprep.subr.bf16.mxu0 %v481_v0  ;;  %312 = vmatprep.mubr.msk.f32.mxu0 %vm482_vm0, %v483_v1  ;;  %v43_v2 = vld [vmem:[#allocation5] sm:$0xff]  ;;  %v44_v3 = vld [vmem:[#allocation5 + $0x8] sm:$0xff]  ;;  %vm538_vm2 = vmpackc.low %vm59_vm1, %vm59_vm1  ;;  %v183_v28 = vlaneseq  ;;  %vm189_vm4 = vcmask 1041408   ;;  %s484_s1 = smov [#allocation8]   ;;  %s485_s16 = smov [#allocation7]  }
  0x2a   :  { %v316_v5 = vpack.c.bf16 %v44_v3, %v43_v2  ;;  %v45_v6 = vld [vmem:[#allocation5 + $0x10] sm:$0xff]  ;;  %v46_v7 = vld [vmem:[#allocation5 + $0x18] sm:$0xff]  ;;  %v47_v9 = vld [vmem:[#allocation5 + $0x20] sm:$0xff]  ;;  %s219_s15 = sshll.u32 %s484_s1, 4  ;;  %s209_s17 = sshll.u32 %s485_s16, 4  ;;  %s220_s15 = int_to_ptr.vmem [resolvable:$true] %s219_s15  ;;  %s210_s17 = int_to_ptr.vmem [resolvable:$true] %s209_s17 }
  0x2b   :  { %v320_v8 = vpack.c.bf16 %v46_v7, %v45_v6  ;;  %v48_v10 = vld [vmem:[#allocation5 + $0x28] sm:$0xff]  ;;  %v49_v12 = vld [vmem:[#allocation5 + $0x30] sm:$0xff]  ;;  %v50_v13 = vld [vmem:[#allocation5 + $0x38] sm:$0xff]  ;;  %v184_v29 = vand.u32 127, %v183_v28  ;;  %s403_s18 = scalar_lea.vmem %s220_s15, 32  ;;  %p408_p3 = scmp.lt.s32.totalorder %s220_s15, %s220_s15 }
  0x2c   :  { %318 = vmatpush3.bf16.xpose.msk.msra.mxu0 %vm538_vm2, %v316_v5  ;;  %v324_v11 = vpack.c.bf16 %v48_v10, %v47_v9  ;;  %v328_v14 = vpack.c.bf16 %v50_v13, %v49_v12  ;;  %v51_v15 = vld [vmem:[#allocation5 + $0x40] sm:$0xff]  ;;  %v52_v16 = vld [vmem:[#allocation5 + $0x48] sm:$0xff]  ;;  %v53_v18 = vld [vmem:[#allocation5 + $0x50] sm:$0xff]  ;;  %p404_p2 = scmp.ne.s32.totalorder %s220_s15, %s403_s18  ;;  %p409_p4 = scmp.lt.s32.totalorder %s403_s18, %s403_s18 }
  0x2d   :  { %319 = vmatprep.subr.bf16.mxu0 %v481_v0  ;;  %v332_v17 = vpack.c.bf16 %v52_v16, %v51_v15  ;;  %v54_v19 = vld [vmem:[#allocation5 + $0x58] sm:$0xff]  ;;  %v55_v21 = vld [vmem:[#allocation5 + $0x60] sm:$0xff]  ;;  %v56_v22 = vld [vmem:[#allocation5 + $0x68] sm:$0xff]  ;;  %vm187_vm3 = vcmp.lt.s32.totalorder %v184_v29, 8 }
  0x2e   :  { %v336_v20 = vpack.c.bf16 %v54_v19, %v53_v18  ;;  %v340_v23 = vpack.c.bf16 %v56_v22, %v55_v21  ;;  %v57_v24 = vld [vmem:[#allocation5 + $0x70] sm:$0xff]  ;;  %v58_v25 = vld [vmem:[#allocation5 + $0x78] sm:$0xff]  ;;  %p410_p5 = por %p409_p4, %p408_p3 }
  0x2f   :  { %v344_v26 = vpack.c.bf16 %v58_v25, %v57_v24  ;;  %v42_v27 = vld [vmem:[#allocation2] sm:$0x3] }
  0x30   :  { %p411_p6 = pnand %p410_p5, %p404_p2 }
  0x34   :  { %322 = vmatpush3.bf16.xpose.msk.msra.mxu0 %vm538_vm2, %v320_v8 }
  0x35   :  { %323 = vmatprep.subr.bf16.mxu0 %v481_v0 }
  0x3c   :  { %326 = vmatpush3.bf16.xpose.msk.msra.mxu0 %vm538_vm2, %v324_v11 }
  0x3d   :  { %327 = vmatprep.subr.bf16.mxu0 %v481_v0 }
  0x44   :  { %330 = vmatpush3.bf16.xpose.msk.msra.mxu0 %vm538_vm2, %v328_v14 }
  0x45   :  { %331 = vmatprep.subr.bf16.mxu0 %v481_v0 }
  0x4c   :  { %334 = vmatpush3.bf16.xpose.msk.msra.mxu0 %vm538_vm2, %v332_v17 }
  0x4d   :  { %335 = vmatprep.subr.bf16.mxu0 %v481_v0 }
  0x54   :  { %338 = vmatpush3.bf16.xpose.msk.msra.mxu0 %vm538_vm2, %v336_v20 }
  0x55   :  { %339 = vmatprep.subr.bf16.mxu0 %v481_v0 }
  0x5c   :  { %342 = vmatpush3.bf16.xpose.msk.msra.mxu0 %vm538_vm2, %v340_v23 }
  0x5d   :  { %343 = vmatprep.subr.bf16.mxu0 %v481_v0 }
  0x64   :  { %346 = vmatpush3.bf16.xpose.msk.msra.mxu0 %vm538_vm2, %v344_v26 }
  0x6b   :  { %313 = vmatmul.mubr.msk.f32.vlgmr.msra.gmra.mrb[0].mxu0 %vm59_vm1, %v42_v27 }
 0x13e   :  { %v177_v30 = vpop.f32.mrb[0].mxu0 }
 0x13f   :  { %v181_v31 = vmul.f32 0.17677669, %v177_v30  ;;  %v314_v32 = vpop.f32.mrb[1].mxu0 }
 0x141   :  { %v188_v33 = vsel %vm187_vm3, %v181_v31, -inf }
 0x142   :  { %v190_v34 = vsel %vm189_vm4, %v188_v33, -inf }
 0x143   :  { %191 = vmax.xlane.f32.xlu0 %v190_v34 }
 0x1d0   :  { %v192_v35 = vpop.xlane.xlu0 %191 }
 0x1d1   :  { %v193_v36 = vsub.f32 %v188_v33, %v192_v35  ;;  %201 = vst [vmem:[#allocation8] sm:$0x3] %v192_v35 }
 0x1d3   :  { %v194_v37 = vmul.f32 1.442695, %v193_v36 }
 0x1d5   :  { %357 = vpow2.f32 %v194_v37 }
 0x1df   :  { %v358_v38 = vpop.eup %357 }
 0x1e0   :  { %v196_v39 = vsel %vm187_vm3, %v358_v38, 0.0 }
 0x1e1   :  { %v197_v40 = vsel %vm189_vm4, %v196_v39, 0.0  ;;  %200 = vst [vmem:[#allocation7] sm:$0x3] %v196_v39 }
 0x1e2   :  { %198 = vadd.xlane.f32.xlu0 %v197_v40 }
 0x1e3   :  { %414 = shalt.err (!%p411_p6)
}
 0x1e4   :  { %s415_s21 = scalar_lea.hbm %s598_s3, 32 }
 0x1e5   :  { %p416_p7 = scmp.ne.s32.totalorder %s598_s3, %s415_s21  ;;  %p419_p8 = scmp.lt.u32.totalorder %s415_s21, %s598_s3 }
 0x1e7   :  { %p421_p9 = pnand %p419_p8, %p416_p7 }
 0x1e9   :  { %424 = shalt.err (!%p421_p9)
}
 0x1ea   :  { %222 = dma.vmem_to_hbm [thread:$0]  %s220_s15, 32, %s598_s3, [#allocation9]  }
 0x1eb   :  { %s425_s28 = scalar_lea.vmem %s210_s17, 32  ;;  %p430_p11 = scmp.lt.s32.totalorder %s210_s17, %s210_s17 }
 0x1ec   :  { %p426_p10 = scmp.ne.s32.totalorder %s210_s17, %s425_s28  ;;  %p431_p12 = scmp.lt.s32.totalorder %s425_s28, %s425_s28 }
 0x1ee   :  { %p432_p13 = por %p431_p12, %p430_p11 }
 0x1f0   :  { %p433_p0 = pnand %p432_p13, %p426_p10 }
 0x1f2   :  { %436 = shalt.err (!%p433_p0)
}
 0x1f3   :  { %s437_s5 = scalar_lea.hbm %s597_s2, 32 }
 0x1f4   :  { %p438_p1 = scmp.ne.s32.totalorder %s597_s2, %s437_s5  ;;  %p441_p2 = scmp.lt.u32.totalorder %s437_s5, %s597_s2 }
 0x1f6   :  { %p443_p3 = pnand %p441_p2, %p438_p1 }
 0x1f8   :  { %446 = shalt.err (!%p443_p3)
}
 0x1f9   :  { %212 = dma.vmem_to_hbm [thread:$0]  %s210_s17, 32, %s597_s2, [#allocation4]  }
 0x1fa   :  { %s486_s0 = smov [#allocation10]  }
 0x1fb   :  { %s229_s11 = sshll.u32 %s486_s0, 4  ;;  %s230_s11 = int_to_ptr.vmem [resolvable:$true] %s229_s11 }
 0x1fc   :  { %s447_s12 = scalar_lea.vmem %s230_s11, 32  ;;  %p452_p5 = scmp.lt.s32.totalorder %s230_s11, %s230_s11 }
 0x1fd   :  { %p448_p4 = scmp.ne.s32.totalorder %s230_s11, %s447_s12  ;;  %p453_p6 = scmp.lt.s32.totalorder %s447_s12, %s447_s12 }
 0x1ff   :  { %p454_p7 = por %p453_p6, %p452_p5 }
 0x201   :  { %p455_p8 = pnand %p454_p7, %p448_p4 }
 0x26f   :  { %v199_v41 = vpop.xlane.xlu0 %198 }
 0x270   :  { %202 = vst [vmem:[#allocation10] sm:$0x3] %v199_v41 }
 0x271   :  { %458 = shalt.err (!%p455_p8)
}
 0x272   :  { %s459_s1 = scalar_lea.hbm %s599_s4, 32 }
 0x273   :  { %p460_p9 = scmp.ne.s32.totalorder %s599_s4, %s459_s1  ;;  %p463_p10 = scmp.lt.u32.totalorder %s459_s1, %s599_s4 }
 0x275   :  { %p465_p11 = pnand %p463_p10, %p460_p9 }
 0x277   :  { %468 = shalt.err (!%p465_p11)
}
 0x278   :  { %232 = dma.vmem_to_hbm [thread:$0]  %s230_s11, 32, %s599_s4, [#allocation9]  }
 0x279   :  { %473 = dma.done.wait [#allocation4], 32  }
 0x27a   :  { %474 = vsyncadd [#allocation4], 4294967264 }
 0x27b   :  { %475 = dma.done.wait [#allocation9], 64  }
 0x27c   :  { %476 = vsyncadd [#allocation9], 4294967232 }
 0x27d   :  { %242 = vsyncpa [#allocation3], 1 }
 0x27e   :  { %243 = vsyncpa [#allocation6], 1 }
 0x27f   :  { %244 = vsyncpa [#allocation4], 1 }
 0x280   :  { %245 = vsyncpa [#allocation9], 1 }

</bundles_post_ra>
